<compile_context>
chip_gen: v7x
topology: tpu7x:2x2x1
jax: 0.10.0
libtpu: 0.0.40
codegen_flags: <defaults>
</compile_context>

<pallas_src>
import functools

import jax
import jax.numpy as jnp
from jax.experimental import pallas as pl
from jax.experimental.pallas import tpu as pltpu

LANE = 128

_MOSAIC = pltpu.CompilerParams(
    dimension_semantics=("parallel",),
    vmem_limit_bytes=32 * 1024 * 1024,
)


def _round_up(n, m):
    return ((n + m - 1) // m) * m


def _pool_row_tile(rows):
    if rows <= 512:
        return rows
    t = 512
    while t >= 8:
        if rows % t == 0:
            return t
        t -= 8
    return rows


# ----------------------------- Pallas kernels ------------------------------ #

def _pool_kernel(x_ref, o_ref):
    # x_ref: (tm, 2*W); lanes [0, W) = image row 2i, lanes [W, 2W) = image row 2i+1.
    x = x_ref[...]
    wi = x.shape[1] // 2
    wo = wi // 2
    v = jnp.maximum(x[:, :wi], x[:, wi:])                     # vertical 2-max
    # horizontal 2-max: unrolled static column slices (wo is small for this module).
    for c in range(wo):
        o_ref[:, c:c + 1] = jnp.maximum(v[:, 2 * c:2 * c + 1],
                                        v[:, 2 * c + 1:2 * c + 2])


def _mm_bias_kernel(x_ref, w_ref, b_ref, o_ref):
    # bf16 x bf16 -> f32 accumulation on the MXU, + f32 bias.
    acc = jnp.dot(x_ref[...], w_ref[...], preferred_element_type=jnp.float32)
    o_ref[...] = acc + b_ref[...]


def _mm_stats_kernel(x_ref, w_ref, y_ref, st_ref):
    # Matmul fused with BatchNorm partial-statistics accumulation for this M-tile.
    y = jnp.dot(x_ref[...], w_ref[...], preferred_element_type=jnp.float32)
    y_ref[...] = y
    st_ref[0:1, :] = jnp.sum(y, axis=0, keepdims=True)        # per-channel sum
    st_ref[1:2, :] = jnp.sum(y * y, axis=0, keepdims=True)    # per-channel sum of squares
    st_ref[2:8, :] = jnp.zeros((6, y.shape[1]), jnp.float32)


def _affine_relu_kernel(y_ref, s_ref, t_ref, o_ref):
    # Folded BatchNorm (scale/shift) + ReLU, lane-dense.
    o_ref[...] = jnp.maximum(y_ref[...] * s_ref[...] + t_ref[...], 0.0)


# ----------------------------- Pallas wrappers ------------------------------ #

def maxpool2x2(x):
    # x: (B, C, H, W) -> (B, C, H//2, W//2); single contiguous view, tiled parallel grid.
    B, C, H, W = x.shape
    Ho, Wo = H // 2, W // 2
    rows = B * C * Ho
    xv = x.reshape(rows, 2 * W)          # free reshape: rows pair (h=2i, h=2i+1)
    tm = _pool_row_tile(rows)
    out = pl.pallas_call(
        _pool_kernel,
        out_shape=jax.ShapeDtypeStruct((rows, Wo), x.dtype),
        grid=(rows // tm,),
        in_specs=[pl.BlockSpec((tm, 2 * W), lambda i: (i, 0))],
        out_specs=pl.BlockSpec((tm, Wo), lambda i: (i, 0)),
        compiler_params=_MOSAIC,
    )(xv)
    return out.reshape(B, C, Ho, Wo)


def matmul_bias(x, w, b, tm):
    # x: (Mp, Kp) bf16, w: (Kp, Np) bf16, b: (1, Np) f32 -> (Mp, Np) f32
    Mp, Kp = x.shape
    _, Np = w.shape
    return pl.pallas_call(
        _mm_bias_kernel,
        out_shape=jax.ShapeDtypeStruct((Mp, Np), jnp.float32),
        grid=(Mp // tm,),
        in_specs=[pl.BlockSpec((tm, Kp), lambda i: (i, 0)),
                  pl.BlockSpec((Kp, Np), lambda i: (0, 0)),
                  pl.BlockSpec((1, Np), lambda i: (0, 0))],
        out_specs=pl.BlockSpec((tm, Np), lambda i: (i, 0)),
        compiler_params=_MOSAIC,
    )(x, w, b)


def matmul_stats(x, w, tm):
    # Returns y = x @ w and per-tile partial BN stats (rows 0/1 of each 8-row block).
    Mp, Kp = x.shape
    _, Np = w.shape
    nsteps = Mp // tm
    return pl.pallas_call(
        _mm_stats_kernel,
        out_shape=(jax.ShapeDtypeStruct((Mp, Np), jnp.float32),
                   jax.ShapeDtypeStruct((nsteps * 8, Np), jnp.float32)),
        grid=(nsteps,),
        in_specs=[pl.BlockSpec((tm, Kp), lambda i: (i, 0)),
                  pl.BlockSpec((Kp, Np), lambda i: (0, 0))],
        out_specs=(pl.BlockSpec((tm, Np), lambda i: (i, 0)),
                   pl.BlockSpec((8, Np), lambda i: (i, 0))),
        compiler_params=_MOSAIC,
    )(x, w)


def affine_relu(y, scale, shift, tm):
    Mp, Np = y.shape
    return pl.pallas_call(
        _affine_relu_kernel,
        out_shape=jax.ShapeDtypeStruct((Mp, Np), jnp.float32),
        grid=(Mp // tm,),
        in_specs=[pl.BlockSpec((tm, Np), lambda i: (i, 0)),
                  pl.BlockSpec((1, Np), lambda i: (0, 0)),
                  pl.BlockSpec((1, Np), lambda i: (0, 0))],
        out_specs=pl.BlockSpec((tm, Np), lambda i: (i, 0)),
        compiler_params=_MOSAIC,
    )(y, scale, shift)


# ----------------------------- plain-JAX glue ------------------------------ #

def im2col_3x3_pad1(x):
    # x: (B, C, h, w) -> (B*h*w, C*9), ordering c*9 + kr*3 + kc (matches weight flatten).
    B, C, h, w = x.shape
    xp = jnp.pad(x, ((0, 0), (0, 0), (1, 1), (1, 1)))
    cols = [xp[:, :, kr:kr + h, kc:kc + w] for kr in range(3) for kc in range(3)]
    pat = jnp.stack(cols, axis=2)                       # (B, C, 9, h, w)
    return pat.transpose(0, 3, 4, 1, 2).reshape(B * h * w, C * 9)


def deform_sample(x, offset, ks=3):
    # Bilinear sampling at p = p_0 + p_n + offset (reference DeformConv2d, padding=0).
    # x: (B, C, h, w); offset: (B, 2N, h, w) -> (B*h*w, C*N)
    # TODO(synk): data-dependent gather stays in plain JAX (no clean Pallas equivalent).
    B, C, h, w = x.shape
    N = ks * ks
    rng = jnp.arange(-(ks - 1) // 2, (ks - 1) // 2 + 1, dtype=jnp.float32)
    pnx, pny = jnp.meshgrid(rng, rng, indexing="ij")
    p_n = jnp.concatenate([pnx.reshape(-1), pny.reshape(-1)])          # (2N,)
    p0x, p0y = jnp.meshgrid(jnp.arange(1, h + 1, dtype=jnp.float32),
                            jnp.arange(1, w + 1, dtype=jnp.float32), indexing="ij")
    p_0 = jnp.concatenate([jnp.broadcast_to(p0x[None, None], (1, N, h, w)),
                           jnp.broadcast_to(p0y[None, None], (1, N, h, w))], axis=1)
    p = p_0 + p_n[None, :, None, None] + offset                         # (B, 2N, h, w)
    p = p.transpose(0, 2, 3, 1)                                         # (B, h, w, 2N)

    q_lt = jnp.floor(p)
    q_rb = q_lt + 1.0
    qlt_x = jnp.clip(q_lt[..., :N], 0, h - 1)
    qlt_y = jnp.clip(q_lt[..., N:], 0, w - 1)
    qrb_x = jnp.clip(q_rb[..., :N], 0, h - 1)
    qrb_y = jnp.clip(q_rb[..., N:], 0, w - 1)
    px = jnp.clip(p[..., :N], 0, h - 1)
    py = jnp.clip(p[..., N:], 0, w - 1)

    x_flat = x.reshape(B, C, h * w)

    def gather(qx, qy):
        idx = (qx * w + qy).astype(jnp.int32).reshape(B, 1, h * w * N)
        idx = jnp.broadcast_to(idx, (B, C, h * w * N))
        return jnp.take_along_axis(x_flat, idx, axis=2).reshape(B, C, h, w, N)

    corners = [
        (qlt_x, qlt_y, (1 + (qlt_x - px)) * (1 + (qlt_y - py))),
        (qrb_x, qrb_y, (1 - (qrb_x - px)) * (1 - (qrb_y - py))),
        (qlt_x, qrb_y, (1 + (qlt_x - px)) * (1 - (qrb_y - py))),
        (qrb_x, qlt_y, (1 - (qrb_x - px)) * (1 + (qlt_y - py))),
    ]
    x_off = None
    for qx, qy, g in corners:           # incremental accumulation (no 4x materialization)
        contrib = g[:, None] * gather(qx, qy)
        x_off = contrib if x_off is None else x_off + contrib
    # flatten with ordering c*N + n (matches conv weight flatten (out, c, kr, kc))
    return x_off.transpose(0, 2, 3, 1, 4).reshape(B * h * w, C * N)


# ----------------------------- Pallas forward ------------------------------ #

def deform_conv_block(x, q):
    # DeformConv2d(kernel=3, padding=0) -> BatchNorm2d (batch stats) -> ReLU
    B, C, h, w = x.shape
    ks, N = 3, 9
    K = C * N
    cout = q["gamma"].shape[0]
    Kp = q["p_w"].shape[0]
    NPm = q["w"].shape[1]
    M = B * h * w
    tm = min(512, _round_up(M, 8))
    Mp = _round_up(M, tm)

    # offset conv: Conv2d(C, 2N, 3, padding=1) as im2col + Pallas matmul (bf16 in / f32 acc)
    patches = im2col_3x3_pad1(x)                                        # (M, K) f32
    patches = jnp.pad(patches, ((0, Mp - M), (0, Kp - K))).astype(jnp.bfloat16)
    off = matmul_bias(patches, q["p_w"], q["p_b"], tm)                  # (Mp, 128) f32
    offset = off[:M, :2 * N].reshape(B, h, w, 2 * N).transpose(0, 3, 1, 2)

    # deformable bilinear sampling, then the KxK conv (== matmul) fused with BN stats
    xs = deform_sample(x, offset, ks)                                   # (M, K) f32
    xs = jnp.pad(xs, ((0, Mp - M), (0, q["w"].shape[0] - K))).astype(jnp.bfloat16)
    y, stats = matmul_stats(xs, q["w"], tm)                             # (Mp,NPm), (steps*8,NPm)

    # finish BatchNorm from the per-tile partial sums (tiny per-channel math),
    # then one fused, tiled scale+shift+ReLU pass over the y tiles.
    st = stats.reshape(-1, 8, NPm)
    mean = st[:, 0, :].sum(axis=0) / M
    var = jnp.maximum(st[:, 1, :].sum(axis=0) / M - mean * mean, 0.0)
    inv = jax.lax.rsqrt(var + 1e-5)
    gamma = jnp.pad(q["gamma"], (0, NPm - cout))
    beta = jnp.pad(q["beta"], (0, NPm - cout))
    scale = (gamma * inv).reshape(1, NPm)
    shift = (beta - mean * gamma * inv).reshape(1, NPm)
    yact = affine_relu(y, scale, shift, tm)                             # (Mp, NPm) f32
    return yact[:M, :cout].reshape(B, h, w, cout).transpose(0, 3, 1, 2)


def deform_down_forward(x, prepped):
    y = maxpool2x2(x)
    y = deform_conv_block(y, prepped["block1"])
    y = deform_conv_block(y, prepped["block2"])
    return y


# ----------------------------- pure-JAX reference ------------------------------ #

def _maxpool_ref(x):
    B, C, H, W = x.shape
    return x.reshape(B, C, H // 2, 2, W // 2, 2).max(axis=(3, 5))


def _mm_ref(a, w, b=None, bf16=True):
    if bf16:
        a = a.astype(jnp.bfloat16)
        w = w.astype(jnp.bfloat16)
    y = jnp.dot(a, w, preferred_element_type=jnp.float32)
    return y if b is None else y + b


def _bn_relu_ref(y, gamma, beta):
    mean = jnp.mean(y, axis=0, keepdims=True)
    var = jnp.mean(jnp.square(y - mean), axis=0, keepdims=True)
    return jnp.maximum((y - mean) * jax.lax.rsqrt(var + 1e-5) * gamma + beta, 0.0)


def deform_conv_block_ref(x, p, bf16):
    B, C, h, w = x.shape
    N = 9
    cout = p["w"].shape[0]
    patches = im2col_3x3_pad1(x)
    off = _mm_ref(patches, p["p_w"].reshape(2 * N, C * N).T,
                  p["p_b"].reshape(1, 2 * N), bf16)
    offset = off.reshape(B, h, w, 2 * N).transpose(0, 3, 1, 2)
    xs = deform_sample(x, offset, 3)
    y = _mm_ref(xs, p["w"].reshape(cout, C * N).T, None, bf16)
    y = _bn_relu_ref(y, p["gamma"].reshape(1, cout), p["beta"].reshape(1, cout))
    return y.reshape(B, h, w, cout).transpose(0, 3, 1, 2)


def deform_down_ref(x, params, bf16_matmul=True):
    y = _maxpool_ref(x)
    y = deform_conv_block_ref(y, params["block1"], bf16_matmul)
    y = deform_conv_block_ref(y, params["block2"], bf16_matmul)
    return y


# ----------------------------- params ------------------------------ #

def init_params(key, in_ch, out_ch):
    ks = 3

    def block(k, cin, cout):
        k1, k2, k3 = jax.random.split(k, 3)
        return dict(
            # NOTE: reference inits p_conv weight to 0; use small random so the deform
            # path is actually exercised.
            p_w=0.1 * jax.random.normal(k1, (2 * ks * ks, cin, ks, ks), jnp.float32),
            p_b=0.1 * jax.random.normal(k2, (2 * ks * ks,), jnp.float32),
            w=jax.random.normal(k3, (cout, cin, ks, ks), jnp.float32) / jnp.sqrt(cin * ks * ks),
            gamma=jnp.ones((cout,), jnp.float32),
            beta=jnp.zeros((cout,), jnp.float32),
        )

    ka, kb = jax.random.split(key)
    return dict(block1=block(ka, in_ch, out_ch), block2=block(kb, out_ch, out_ch))


def prepare_params(params):
    """One-time weight prep (reshape / transpose / pad to 128 lanes / bf16 cast)."""
    prepped = {}
    for name, p in params.items():
        cout, cin, ks, _ = p["w"].shape
        n = ks * ks
        k = cin * n
        kp = _round_up(k, LANE)
        np_off = _round_up(2 * n, LANE)
        np_main = _round_up(cout, LANE)
        p_w = p["p_w"].reshape(2 * n, k).T
        p_w = jnp.pad(p_w, ((0, kp - k), (0, np_off - 2 * n))).astype(jnp.bfloat16)
        p_b = jnp.pad(p["p_b"].reshape(1, 2 * n),
                      ((0, 0), (0, np_off - 2 * n))).astype(jnp.float32)
        w = p["w"].reshape(cout, k).T
        w = jnp.pad(w, ((0, kp - k), (0, np_main - cout))).astype(jnp.bfloat16)
        prepped[name] = dict(p_w=p_w, p_b=p_b, w=w, gamma=p["gamma"], beta=p["beta"])
    return prepped


# ----------------------------- main ------------------------------ #

if __name__ == "__main__":
    B, in_ch, out_ch, H, W = 2, 4, 8, 16, 16
    key = jax.random.PRNGKey(0)
    kx, kp = jax.random.split(key)
    x = jax.random.normal(kx, (B, in_ch, H, W), jnp.float32)
    params = init_params(kp, in_ch, out_ch)
    prepped = prepare_params(params)     # outside the per-call hot path

    fwd = jax.jit(deform_down_forward)
    out = fwd(x, prepped)
    jax.block_until_ready(out)

    # Pure-JAX reference with the same bf16-in / f32-acc matmul policy as the kernels.
    ref = jax.jit(functools.partial(deform_down_ref, bf16_matmul=True))(x, params)
    jax.block_until_ready(ref)

    assert out.shape == (B, out_ch, H // 2, W // 2), out.shape
    assert bool(jnp.all(jnp.isfinite(out)))
    err = float(jnp.max(jnp.abs(out - ref)))
    assert err < 5e-3, err

    print("KERNEL_OK")
</pallas_src>

<mosaic_0001>
module attributes {stable_mosaic.version = 11 : i64} {
  func.func @_pool_kernel(%arg0: i32, %arg1: memref<64x32xf32, #tpu.memory_space<vmem>>, %arg2: memref<64x8xf32, #tpu.memory_space<vmem>>) attributes {dimension_semantics = [#tpu.dimension_semantics<parallel>], iteration_bounds = array<i64: 1>, scalar_prefetch = 0 : i64, scratch_operands = 0 : i64, tpu.core_type = #tpu.core_type<tc>, window_params = [{transform_indices = @transform_0, window_bounds = array<i64: 64, 32>}, {transform_indices = @transform_1, window_bounds = array<i64: 64, 8>}]} {
    %c0 = arith.constant 0 : index
    %c0_0 = arith.constant 0 : index
    %0 = vector.load %arg1[%c0, %c0_0] : memref<64x32xf32, #tpu.memory_space<vmem>>, vector<64x32xf32>
    %1 = vector.extract_strided_slice %0 {offsets = [0, 0], sizes = [64, 16], strides = [1, 1]} : vector<64x32xf32> to vector<64x16xf32>
    %2 = vector.extract_strided_slice %0 {offsets = [0, 16], sizes = [64, 16], strides = [1, 1]} : vector<64x32xf32> to vector<64x16xf32>
    %3 = arith.maximumf %1, %2 : vector<64x16xf32>
    %4 = vector.extract_strided_slice %3 {offsets = [0, 0], sizes = [64, 1], strides = [1, 1]} : vector<64x16xf32> to vector<64x1xf32>
    %5 = vector.extract_strided_slice %3 {offsets = [0, 1], sizes = [64, 1], strides = [1, 1]} : vector<64x16xf32> to vector<64x1xf32>
    %6 = arith.maximumf %4, %5 : vector<64x1xf32>
    %c0_1 = arith.constant 0 : index
    %c0_2 = arith.constant 0 : index
    %7 = vector.load %arg2[%c0_1, %c0_2] : memref<64x8xf32, #tpu.memory_space<vmem>>, vector<64x1xf32>
    tpu.vector_store %arg2[%c0_1, %c0_2], %6 {strides = array<i32>} : memref<64x8xf32, #tpu.memory_space<vmem>>, vector<64x1xf32>,
    %8 = vector.extract_strided_slice %3 {offsets = [0, 2], sizes = [64, 1], strides = [1, 1]} : vector<64x16xf32> to vector<64x1xf32>
    %9 = vector.extract_strided_slice %3 {offsets = [0, 3], sizes = [64, 1], strides = [1, 1]} : vector<64x16xf32> to vector<64x1xf32>
    %10 = arith.maximumf %8, %9 : vector<64x1xf32>
    %c0_3 = arith.constant 0 : index
    %c1 = arith.constant 1 : index
    %11 = vector.load %arg2[%c0_3, %c1] : memref<64x8xf32, #tpu.memory_space<vmem>>, vector<64x1xf32>
    tpu.vector_store %arg2[%c0_3, %c1], %10 {strides = array<i32>} : memref<64x8xf32, #tpu.memory_space<vmem>>, vector<64x1xf32>,
    %12 = vector.extract_strided_slice %3 {offsets = [0, 4], sizes = [64, 1], strides = [1, 1]} : vector<64x16xf32> to vector<64x1xf32>
    %13 = vector.extract_strided_slice %3 {offsets = [0, 5], sizes = [64, 1], strides = [1, 1]} : vector<64x16xf32> to vector<64x1xf32>
    %14 = arith.maximumf %12, %13 : vector<64x1xf32>
    %c0_4 = arith.constant 0 : index
    %c2 = arith.constant 2 : index
    %15 = vector.load %arg2[%c0_4, %c2] : memref<64x8xf32, #tpu.memory_space<vmem>>, vector<64x1xf32>
    tpu.vector_store %arg2[%c0_4, %c2], %14 {strides = array<i32>} : memref<64x8xf32, #tpu.memory_space<vmem>>, vector<64x1xf32>,
    %16 = vector.extract_strided_slice %3 {offsets = [0, 6], sizes = [64, 1], strides = [1, 1]} : vector<64x16xf32> to vector<64x1xf32>
    %17 = vector.extract_strided_slice %3 {offsets = [0, 7], sizes = [64, 1], strides = [1, 1]} : vector<64x16xf32> to vector<64x1xf32>
    %18 = arith.maximumf %16, %17 : vector<64x1xf32>
    %c0_5 = arith.constant 0 : index
    %c3 = arith.constant 3 : index
    %19 = vector.load %arg2[%c0_5, %c3] : memref<64x8xf32, #tpu.memory_space<vmem>>, vector<64x1xf32>
    tpu.vector_store %arg2[%c0_5, %c3], %18 {strides = array<i32>} : memref<64x8xf32, #tpu.memory_space<vmem>>, vector<64x1xf32>,
    %20 = vector.extract_strided_slice %3 {offsets = [0, 8], sizes = [64, 1], strides = [1, 1]} : vector<64x16xf32> to vector<64x1xf32>
    %21 = vector.extract_strided_slice %3 {offsets = [0, 9], sizes = [64, 1], strides = [1, 1]} : vector<64x16xf32> to vector<64x1xf32>
    %22 = arith.maximumf %20, %21 : vector<64x1xf32>
    %c0_6 = arith.constant 0 : index
    %c4 = arith.constant 4 : index
    %23 = vector.load %arg2[%c0_6, %c4] : memref<64x8xf32, #tpu.memory_space<vmem>>, vector<64x1xf32>
    tpu.vector_store %arg2[%c0_6, %c4], %22 {strides = array<i32>} : memref<64x8xf32, #tpu.memory_space<vmem>>, vector<64x1xf32>,
    %24 = vector.extract_strided_slice %3 {offsets = [0, 10], sizes = [64, 1], strides = [1, 1]} : vector<64x16xf32> to vector<64x1xf32>
    %25 = vector.extract_strided_slice %3 {offsets = [0, 11], sizes = [64, 1], strides = [1, 1]} : vector<64x16xf32> to vector<64x1xf32>
    %26 = arith.maximumf %24, %25 : vector<64x1xf32>
    %c0_7 = arith.constant 0 : index
    %c5 = arith.constant 5 : index
    %27 = vector.load %arg2[%c0_7, %c5] : memref<64x8xf32, #tpu.memory_space<vmem>>, vector<64x1xf32>
    tpu.vector_store %arg2[%c0_7, %c5], %26 {strides = array<i32>} : memref<64x8xf32, #tpu.memory_space<vmem>>, vector<64x1xf32>,
    %28 = vector.extract_strided_slice %3 {offsets = [0, 12], sizes = [64, 1], strides = [1, 1]} : vector<64x16xf32> to vector<64x1xf32>
    %29 = vector.extract_strided_slice %3 {offsets = [0, 13], sizes = [64, 1], strides = [1, 1]} : vector<64x16xf32> to vector<64x1xf32>
    %30 = arith.maximumf %28, %29 : vector<64x1xf32>
    %c0_8 = arith.constant 0 : index
    %c6 = arith.constant 6 : index
    %31 = vector.load %arg2[%c0_8, %c6] : memref<64x8xf32, #tpu.memory_space<vmem>>, vector<64x1xf32>
    tpu.vector_store %arg2[%c0_8, %c6], %30 {strides = array<i32>} : memref<64x8xf32, #tpu.memory_space<vmem>>, vector<64x1xf32>,
    %32 = vector.extract_strided_slice %3 {offsets = [0, 14], sizes = [64, 1], strides = [1, 1]} : vector<64x16xf32> to vector<64x1xf32>
    %33 = vector.extract_strided_slice %3 {offsets = [0, 15], sizes = [64, 1], strides = [1, 1]} : vector<64x16xf32> to vector<64x1xf32>
    %34 = arith.maximumf %32, %33 : vector<64x1xf32>
    %c0_9 = arith.constant 0 : index
    %c7 = arith.constant 7 : index
    %35 = vector.load %arg2[%c0_9, %c7] : memref<64x8xf32, #tpu.memory_space<vmem>>, vector<64x1xf32>
    tpu.vector_store %arg2[%c0_9, %c7], %34 {strides = array<i32>} : memref<64x8xf32, #tpu.memory_space<vmem>>, vector<64x1xf32>,
    return
  }
  func.func @transform_0(%arg0: i32) -> (i32, i32) {
    %c0_i32 = arith.constant 0 : i32
    %c0_i32_0 = arith.constant 0 : i32
    return %arg0, %c0_i32 : i32, i32
  }
  func.func @transform_1(%arg0: i32) -> (i32, i32) {
    %c0_i32 = arith.constant 0 : i32
    %c0_i32_0 = arith.constant 0 : i32
    return %arg0, %c0_i32 : i32, i32
  }
}

module attributes {stable_mosaic.version = 11 : i64} {
  func.func @_mm_bias_kernel(%arg0: i32, %arg1: memref<128x128xbf16, #tpu.memory_space<vmem>>, %arg2: memref<128x128xbf16, #tpu.memory_space<vmem>>, %arg3: memref<1x128xf32, #tpu.memory_space<vmem>>, %arg4: memref<128x128xf32, #tpu.memory_space<vmem>>) attributes {dimension_semantics = [#tpu.dimension_semantics<parallel>], iteration_bounds = array<i64: 1>, scalar_prefetch = 0 : i64, scratch_operands = 0 : i64, tpu.core_type = #tpu.core_type<tc>, window_params = [{transform_indices = @transform_0, window_bounds = array<i64: 128, 128>}, {pipeline_mode = #tpu.pipeline_mode<synchronous>, transform_indices = @transform_1, window_bounds = array<i64: 128, 128>}, {pipeline_mode = #tpu.pipeline_mode<synchronous>, transform_indices = @transform_2, window_bounds = array<i64: 1, 128>}, {transform_indices = @transform_3, window_bounds = array<i64: 128, 128>}]} {
    %c0 = arith.constant 0 : index
    %c0_0 = arith.constant 0 : index
    %0 = vector.load %arg1[%c0, %c0_0] : memref<128x128xbf16, #tpu.memory_space<vmem>>, vector<128x128xbf16>
    %c0_1 = arith.constant 0 : index
    %c0_2 = arith.constant 0 : index
    %1 = vector.load %arg2[%c0_1, %c0_2] : memref<128x128xbf16, #tpu.memory_space<vmem>>, vector<128x128xbf16>
    %cst = arith.constant dense<0.000000e+00> : vector<128x128xf32>
    %2 = tpu.matmul %0, %1, %cst {dimension_numbers = #tpu.dot_dimension_numbers<[1], [0], [0], [1], [0, 0, 1, 1], [], []>} : vector<128x128xbf16>, vector<128x128xbf16>, vector<128x128xf32> -> vector<128x128xf32>
    %c0_3 = arith.constant 0 : index
    %c0_4 = arith.constant 0 : index
    %3 = vector.load %arg3[%c0_3, %c0_4] : memref<1x128xf32, #tpu.memory_space<vmem>>, vector<1x128xf32>
    %4 = vector.broadcast %3 : vector<1x128xf32> to vector<128x128xf32>
    %5 = arith.addf %2, %4 : vector<128x128xf32>
    %c0_5 = arith.constant 0 : index
    %c0_6 = arith.constant 0 : index
    %6 = vector.load %arg4[%c0_5, %c0_6] : memref<128x128xf32, #tpu.memory_space<vmem>>, vector<128x128xf32>
    tpu.vector_store %arg4[%c0_5, %c0_6], %5 {strides = array<i32>} : memref<128x128xf32, #tpu.memory_space<vmem>>, vector<128x128xf32>,
    return
  }
  func.func @transform_0(%arg0: i32) -> (i32, i32) {
    %c0_i32 = arith.constant 0 : i32
    %c0_i32_0 = arith.constant 0 : i32
    return %arg0, %c0_i32 : i32, i32
  }
  func.func @transform_1(%arg0: i32) -> (i32, i32) {
    %c0_i32 = arith.constant 0 : i32
    %c0_i32_0 = arith.constant 0 : i32
    %c0_i32_1 = arith.constant 0 : i32
    return %c0_i32, %c0_i32_0 : i32, i32
  }
  func.func @transform_2(%arg0: i32) -> (i32, i32) {
    %c0_i32 = arith.constant 0 : i32
    %c0_i32_0 = arith.constant 0 : i32
    %c0_i32_1 = arith.constant 0 : i32
    return %c0_i32, %c0_i32_0 : i32, i32
  }
  func.func @transform_3(%arg0: i32) -> (i32, i32) {
    %c0_i32 = arith.constant 0 : i32
    %c0_i32_0 = arith.constant 0 : i32
    return %arg0, %c0_i32 : i32, i32
  }
}

module attributes {stable_mosaic.version = 11 : i64} {
  func.func @_mm_stats_kernel(%arg0: i32, %arg1: memref<128x128xbf16, #tpu.memory_space<vmem>>, %arg2: memref<128x128xbf16, #tpu.memory_space<vmem>>, %arg3: memref<128x128xf32, #tpu.memory_space<vmem>>, %arg4: memref<8x128xf32, #tpu.memory_space<vmem>>) attributes {dimension_semantics = [#tpu.dimension_semantics<parallel>], iteration_bounds = array<i64: 1>, scalar_prefetch = 0 : i64, scratch_operands = 0 : i64, tpu.core_type = #tpu.core_type<tc>, window_params = [{transform_indices = @transform_0, window_bounds = array<i64: 128, 128>}, {pipeline_mode = #tpu.pipeline_mode<synchronous>, transform_indices = @transform_1, window_bounds = array<i64: 128, 128>}, {transform_indices = @transform_2, window_bounds = array<i64: 128, 128>}, {transform_indices = @transform_3, window_bounds = array<i64: 8, 128>}]} {
    %c0 = arith.constant 0 : index
    %c0_0 = arith.constant 0 : index
    %0 = vector.load %arg1[%c0, %c0_0] : memref<128x128xbf16, #tpu.memory_space<vmem>>, vector<128x128xbf16>
    %c0_1 = arith.constant 0 : index
    %c0_2 = arith.constant 0 : index
    %1 = vector.load %arg2[%c0_1, %c0_2] : memref<128x128xbf16, #tpu.memory_space<vmem>>, vector<128x128xbf16>
    %cst = arith.constant dense<0.000000e+00> : vector<128x128xf32>
    %2 = tpu.matmul %0, %1, %cst {dimension_numbers = #tpu.dot_dimension_numbers<[1], [0], [0], [1], [0, 0, 1, 1], [], []>} : vector<128x128xbf16>, vector<128x128xbf16>, vector<128x128xf32> -> vector<128x128xf32>
    %c0_3 = arith.constant 0 : index
    %c0_4 = arith.constant 0 : index
    %3 = vector.load %arg3[%c0_3, %c0_4] : memref<128x128xf32, #tpu.memory_space<vmem>>, vector<128x128xf32>
    tpu.vector_store %arg3[%c0_3, %c0_4], %2 {strides = array<i32>} : memref<128x128xf32, #tpu.memory_space<vmem>>, vector<128x128xf32>,
    %cst_5 = arith.constant dense<0.000000e+00> : vector<128xf32>
    %4 = vector.multi_reduction <add>, %2, %cst_5 [0] : vector<128x128xf32> to vector<128xf32>
    %5 = vector.shape_cast %4 : vector<128xf32> to vector<1x128xf32>
    %c0_6 = arith.constant 0 : index
    %c0_7 = arith.constant 0 : index
    %6 = vector.load %arg4[%c0_6, %c0_7] : memref<8x128xf32, #tpu.memory_space<vmem>>, vector<1x128xf32>
    tpu.vector_store %arg4[%c0_6, %c0_7], %5 {strides = array<i32>} : memref<8x128xf32, #tpu.memory_space<vmem>>, vector<1x128xf32>,
    %7 = arith.mulf %2, %2 : vector<128x128xf32>
    %cst_8 = arith.constant dense<0.000000e+00> : vector<128xf32>
    %8 = vector.multi_reduction <add>, %7, %cst_8 [0] : vector<128x128xf32> to vector<128xf32>
    %9 = vector.shape_cast %8 : vector<128xf32> to vector<1x128xf32>
    %c1 = arith.constant 1 : index
    %c0_9 = arith.constant 0 : index
    %10 = vector.load %arg4[%c1, %c0_9] : memref<8x128xf32, #tpu.memory_space<vmem>>, vector<1x128xf32>
    tpu.vector_store %arg4[%c1, %c0_9], %9 {strides = array<i32>} : memref<8x128xf32, #tpu.memory_space<vmem>>, vector<1x128xf32>,
    %cst_10 = arith.constant 0.000000e+00 : f32
    %11 = vector.broadcast %cst_10 : f32 to vector<6x128xf32>
    %c2 = arith.constant 2 : index
    %c0_11 = arith.constant 0 : index
    %12 = vector.load %arg4[%c2, %c0_11] : memref<8x128xf32, #tpu.memory_space<vmem>>, vector<6x128xf32>
    tpu.vector_store %arg4[%c2, %c0_11], %11 {strides = array<i32>} : memref<8x128xf32, #tpu.memory_space<vmem>>, vector<6x128xf32>,
    return
  }
  func.func @transform_0(%arg0: i32) -> (i32, i32) {
    %c0_i32 = arith.constant 0 : i32
    %c0_i32_0 = arith.constant 0 : i32
    return %arg0, %c0_i32 : i32, i32
  }
  func.func @transform_1(%arg0: i32) -> (i32, i32) {
    %c0_i32 = arith.constant 0 : i32
    %c0_i32_0 = arith.constant 0 : i32
    %c0_i32_1 = arith.constant 0 : i32
    return %c0_i32, %c0_i32_0 : i32, i32
  }
  func.func @transform_2(%arg0: i32) -> (i32, i32) {
    %c0_i32 = arith.constant 0 : i32
    %c0_i32_0 = arith.constant 0 : i32
    return %arg0, %c0_i32 : i32, i32
  }
  func.func @transform_3(%arg0: i32) -> (i32, i32) {
    %c0_i32 = arith.constant 0 : i32
    %c0_i32_0 = arith.constant 0 : i32
    return %arg0, %c0_i32 : i32, i32
  }
}

module attributes {stable_mosaic.version = 11 : i64} {
  func.func @_affine_relu_kernel(%arg0: i32, %arg1: memref<128x128xf32, #tpu.memory_space<vmem>>, %arg2: memref<1x128xf32, #tpu.memory_space<vmem>>, %arg3: memref<1x128xf32, #tpu.memory_space<vmem>>, %arg4: memref<128x128xf32, #tpu.memory_space<vmem>>) attributes {dimension_semantics = [#tpu.dimension_semantics<parallel>], iteration_bounds = array<i64: 1>, scalar_prefetch = 0 : i64, scratch_operands = 0 : i64, tpu.core_type = #tpu.core_type<tc>, window_params = [{transform_indices = @transform_0, window_bounds = array<i64: 128, 128>}, {pipeline_mode = #tpu.pipeline_mode<synchronous>, transform_indices = @transform_1, window_bounds = array<i64: 1, 128>}, {pipeline_mode = #tpu.pipeline_mode<synchronous>, transform_indices = @transform_2, window_bounds = array<i64: 1, 128>}, {transform_indices = @transform_3, window_bounds = array<i64: 128, 128>}]} {
    %c0 = arith.constant 0 : index
    %c0_0 = arith.constant 0 : index
    %0 = vector.load %arg1[%c0, %c0_0] : memref<128x128xf32, #tpu.memory_space<vmem>>, vector<128x128xf32>
    %c0_1 = arith.constant 0 : index
    %c0_2 = arith.constant 0 : index
    %1 = vector.load %arg2[%c0_1, %c0_2] : memref<1x128xf32, #tpu.memory_space<vmem>>, vector<1x128xf32>
    %2 = vector.broadcast %1 : vector<1x128xf32> to vector<128x128xf32>
    %3 = arith.mulf %0, %2 : vector<128x128xf32>
    %c0_3 = arith.constant 0 : index
    %c0_4 = arith.constant 0 : index
    %4 = vector.load %arg3[%c0_3, %c0_4] : memref<1x128xf32, #tpu.memory_space<vmem>>, vector<1x128xf32>
    %5 = vector.broadcast %4 : vector<1x128xf32> to vector<128x128xf32>
    %6 = arith.addf %3, %5 : vector<128x128xf32>
    %cst = arith.constant 0.000000e+00 : f32
    %7 = vector.broadcast %cst : f32 to vector<128x128xf32>
    %8 = arith.maximumf %6, %7 : vector<128x128xf32>
    %c0_5 = arith.constant 0 : index
    %c0_6 = arith.constant 0 : index
    %9 = vector.load %arg4[%c0_5, %c0_6] : memref<128x128xf32, #tpu.memory_space<vmem>>, vector<128x128xf32>
    tpu.vector_store %arg4[%c0_5, %c0_6], %8 {strides = array<i32>} : memref<128x128xf32, #tpu.memory_space<vmem>>, vector<128x128xf32>,
    return
  }
  func.func @transform_0(%arg0: i32) -> (i32, i32) {
    %c0_i32 = arith.constant 0 : i32
    %c0_i32_0 = arith.constant 0 : i32
    return %arg0, %c0_i32 : i32, i32
  }
  func.func @transform_1(%arg0: i32) -> (i32, i32) {
    %c0_i32 = arith.constant 0 : i32
    %c0_i32_0 = arith.constant 0 : i32
    %c0_i32_1 = arith.constant 0 : i32
    return %c0_i32, %c0_i32_0 : i32, i32
  }
  func.func @transform_2(%arg0: i32) -> (i32, i32) {
    %c0_i32 = arith.constant 0 : i32
    %c0_i32_0 = arith.constant 0 : i32
    %c0_i32_1 = arith.constant 0 : i32
    return %c0_i32, %c0_i32_0 : i32, i32
  }
  func.func @transform_3(%arg0: i32) -> (i32, i32) {
    %c0_i32 = arith.constant 0 : i32
    %c0_i32_0 = arith.constant 0 : i32
    return %arg0, %c0_i32 : i32, i32
  }
}

</mosaic_0001>

<bundles_post_ra>
// kernel: deform_down_forward.7
= control target key start
LH: loop header
LB: loop body
LE: loop exit
PB: predicated region body
PF: predicated region fallthrough
CT: control target
= control target key end

     0   :  { %s356_s10 = smov 112   ;;  %s357_s23 = smov 127   ;;  %vm96_vm0 = vcmask 7168   ;;  %vm137_vm1 = vcmask 15368   ;;  %vm170_vm2 = vcmask 23568   ;;  %vm203_vm3 = vcmask 31768   ;;  %s720_s0 = inlined_call_operand.vmem [shape: f32[64,32], index: 0, kind: input, shape index: {}]   ;;  %s721_s1 = inlined_call_operand.vmem [shape: f32[64,8], index: 1, kind: output, shape index: {}]  }
   0x1   :  { %v8_v0 = vld [vmem:[%s720_s0] sm:$0xff]  ;;  %v10_v1 = vld [vmem:[%s720_s0 + $0x10] sm:$0xff]  ;;  %v9_v2 = vld [vmem:[%s720_s0 + $0x8] sm:$0xff]  ;;  %s358_s8 = smov 126   ;;  %s359_s11 = smov 125   ;;  %vm236_vm4 = vcmask 39968  }
   0x2   :  { %24 = vrot.lane.b32.xlu0 %v8_v0, %s356_s10  ;;  %28 = vrot.lane.b32.xlu1 %v10_v1, %s356_s10  ;;  %v11_v3 = vld [vmem:[%s720_s0 + $0x18] sm:$0xff]  ;;  %v12_v4 = vld [vmem:[%s720_s0 + $0x20] sm:$0xff]  ;;  %s360_s12 = smov 124   ;;  %s361_s13 = smov 123   ;;  %vm269_vm5 = vcmask 48168   ;;  %vm302_vm6 = vcmask 56368  }
   0x3   :  { %v13_v5 = vld [vmem:[%s720_s0 + $0x28] sm:$0xff]  ;;  %v14_v6 = vld [vmem:[%s720_s0 + $0x30] sm:$0xff]  ;;  %v15_v7 = vld [vmem:[%s720_s0 + $0x38] sm:$0xff]  ;;  %s362_s14 = smov 122   ;;  %s363_s15 = smov 121   ;;  %vm335_vm7 = vcmask 64568  }
   0x6   :  { %26 = vrot.lane.b32.xlu0 %v9_v2, %s356_s10  ;;  %30 = vrot.lane.b32.xlu1 %v11_v3, %s356_s10 }
   0xa   :  { %32 = vrot.lane.b32.xlu0 %v12_v4, %s356_s10  ;;  %34 = vrot.lane.b32.xlu1 %v13_v5, %s356_s10 }
   0xe   :  { %36 = vrot.lane.b32.xlu0 %v14_v6, %s356_s10  ;;  %38 = vrot.lane.b32.xlu1 %v15_v7, %s356_s10 }
  0x74   :  { %v25_v8 = vpop.permute.xlu0 %24  ;;  %v29_v9 = vpop.permute.xlu1 %28 }
  0x75   :  { %v48_v10 = vmax.f32 %v8_v0, %v25_v8  ;;  %v50_v11 = vmax.f32 %v10_v1, %v29_v9 }
  0x77   :  { %64 = vrot.lane.b32.xlu0 %v48_v10, %s357_s23 }
  0x78   :  { %v27_v12 = vpop.permute.xlu0 %26  ;;  %v31_v13 = vpop.permute.xlu1 %30 }
  0x79   :  { %v49_v14 = vmax.f32 %v9_v2, %v27_v12  ;;  %v51_v15 = vmax.f32 %v11_v3, %v31_v13 }
  0x7b   :  { %68 = vrot.lane.b32.xlu0 %v50_v11, %s357_s23  ;;  %66 = vrot.lane.b32.xlu1 %v49_v14, %s357_s23 }
  0x7c   :  { %v33_v16 = vpop.permute.xlu0 %32  ;;  %v35_v17 = vpop.permute.xlu1 %34 }
  0x7d   :  { %v52_v18 = vmax.f32 %v12_v4, %v33_v16  ;;  %v53_v19 = vmax.f32 %v13_v5, %v35_v17 }
  0x7f   :  { %70 = vrot.lane.b32.xlu1 %v51_v15, %s357_s23  ;;  %72 = vrot.lane.b32.xlu0 %v52_v18, %s357_s23 }
  0x80   :  { %v37_v20 = vpop.permute.xlu0 %36  ;;  %v39_v21 = vpop.permute.xlu1 %38 }
  0x81   :  { %v54_v22 = vmax.f32 %v14_v6, %v37_v20  ;;  %v55_v23 = vmax.f32 %v15_v7, %v39_v21 }
  0x83   :  { %74 = vrot.lane.b32.xlu1 %v53_v19, %s357_s23  ;;  %76 = vrot.lane.b32.xlu0 %v54_v22, %s357_s23 }
  0x87   :  { %78 = vrot.lane.b32.xlu1 %v55_v23, %s357_s23 }
  0xe9   :  { %v65_v24 = vpop.permute.xlu0 %64 }
  0xea   :  { %v406_v25 = vmax.f32 %v48_v10, %v65_v24 }
  0xec   :  { %113 = vrot.lane.b32.xlu0 %v406_v25, %s357_s23  ;;  %97 = vst.msk [vmem:[%s721_s1] sm:$0xff] %vm96_vm0, %v406_v25 }
  0xed   :  { %v67_v26 = vpop.permute.xlu1 %66  ;;  %v69_v27 = vpop.permute.xlu0 %68 }
  0xee   :  { %v415_v28 = vmax.f32 %v49_v14, %v67_v26  ;;  %v417_v29 = vmax.f32 %v50_v11, %v69_v27 }
  0xf0   :  { %115 = vrot.lane.b32.xlu1 %v415_v28, %s357_s23  ;;  %117 = vrot.lane.b32.xlu0 %v417_v29, %s357_s23  ;;  %98 = vst.msk [vmem:[%s721_s1 + $0x8] sm:$0xff] %vm96_vm0, %v415_v28  ;;  %99 = vst.msk [vmem:[%s721_s1 + $0x10] sm:$0xff] %vm96_vm0, %v417_v29 }
  0xf1   :  { %v71_v30 = vpop.permute.xlu1 %70  ;;  %v73_v31 = vpop.permute.xlu0 %72 }
  0xf2   :  { %v433_v32 = vmax.f32 %v51_v15, %v71_v30  ;;  %v435_v33 = vmax.f32 %v52_v18, %v73_v31 }
  0xf4   :  { %119 = vrot.lane.b32.xlu1 %v433_v32, %s357_s23  ;;  %121 = vrot.lane.b32.xlu0 %v435_v33, %s357_s23  ;;  %100 = vst.msk [vmem:[%s721_s1 + $0x18] sm:$0xff] %vm96_vm0, %v433_v32  ;;  %101 = vst.msk [vmem:[%s721_s1 + $0x20] sm:$0xff] %vm96_vm0, %v435_v33 }
  0xf5   :  { %v75_v34 = vpop.permute.xlu1 %74  ;;  %v77_v35 = vpop.permute.xlu0 %76 }
  0xf6   :  { %v93_v36 = vmax.f32 %v53_v19, %v75_v34  ;;  %v94_v37 = vmax.f32 %v54_v22, %v77_v35 }
  0xf8   :  { %123 = vrot.lane.b32.xlu1 %v93_v36, %s357_s23  ;;  %125 = vrot.lane.b32.xlu0 %v94_v37, %s357_s23  ;;  %102 = vst.msk [vmem:[%s721_s1 + $0x28] sm:$0xff] %vm96_vm0, %v93_v36  ;;  %103 = vst.msk [vmem:[%s721_s1 + $0x30] sm:$0xff] %vm96_vm0, %v94_v37 }
  0xf9   :  { %v79_v38 = vpop.permute.xlu1 %78 }
  0xfa   :  { %v95_v39 = vmax.f32 %v55_v23, %v79_v38 }
  0xfc   :  { %127 = vrot.lane.b32.xlu1 %v95_v39, %s357_s23  ;;  %146 = vrot.lane.b32.xlu0 %v406_v25, %s358_s8  ;;  %104 = vst.msk [vmem:[%s721_s1 + $0x38] sm:$0xff] %vm96_vm0, %v95_v39 }
 0x100   :  { %148 = vrot.lane.b32.xlu1 %v415_v28, %s358_s8  ;;  %150 = vrot.lane.b32.xlu0 %v417_v29, %s358_s8 }
 0x104   :  { %152 = vrot.lane.b32.xlu1 %v433_v32, %s358_s8  ;;  %154 = vrot.lane.b32.xlu0 %v435_v33, %s358_s8 }
 0x108   :  { %156 = vrot.lane.b32.xlu1 %v93_v36, %s358_s8  ;;  %158 = vrot.lane.b32.xlu0 %v94_v37, %s358_s8 }
 0x10c   :  { %160 = vrot.lane.b32.xlu1 %v95_v39, %s358_s8  ;;  %179 = vrot.lane.b32.xlu0 %v406_v25, %s359_s11 }
 0x110   :  { %181 = vrot.lane.b32.xlu1 %v415_v28, %s359_s11  ;;  %183 = vrot.lane.b32.xlu0 %v417_v29, %s359_s11 }
 0x114   :  { %185 = vrot.lane.b32.xlu1 %v433_v32, %s359_s11  ;;  %187 = vrot.lane.b32.xlu0 %v435_v33, %s359_s11 }
 0x118   :  { %189 = vrot.lane.b32.xlu1 %v93_v36, %s359_s11  ;;  %191 = vrot.lane.b32.xlu0 %v94_v37, %s359_s11 }
 0x11c   :  { %193 = vrot.lane.b32.xlu1 %v95_v39, %s359_s11  ;;  %212 = vrot.lane.b32.xlu0 %v406_v25, %s360_s12 }
 0x120   :  { %214 = vrot.lane.b32.xlu1 %v415_v28, %s360_s12  ;;  %216 = vrot.lane.b32.xlu0 %v417_v29, %s360_s12 }
 0x124   :  { %218 = vrot.lane.b32.xlu1 %v433_v32, %s360_s12  ;;  %220 = vrot.lane.b32.xlu0 %v435_v33, %s360_s12 }
 0x128   :  { %222 = vrot.lane.b32.xlu1 %v93_v36, %s360_s12  ;;  %224 = vrot.lane.b32.xlu0 %v94_v37, %s360_s12 }
 0x12c   :  { %226 = vrot.lane.b32.xlu1 %v95_v39, %s360_s12  ;;  %245 = vrot.lane.b32.xlu0 %v406_v25, %s361_s13 }
 0x130   :  { %247 = vrot.lane.b32.xlu1 %v415_v28, %s361_s13  ;;  %249 = vrot.lane.b32.xlu0 %v417_v29, %s361_s13 }
 0x134   :  { %251 = vrot.lane.b32.xlu1 %v433_v32, %s361_s13  ;;  %253 = vrot.lane.b32.xlu0 %v435_v33, %s361_s13 }
 0x138   :  { %255 = vrot.lane.b32.xlu1 %v93_v36, %s361_s13  ;;  %257 = vrot.lane.b32.xlu0 %v94_v37, %s361_s13 }
 0x13c   :  { %259 = vrot.lane.b32.xlu1 %v95_v39, %s361_s13  ;;  %278 = vrot.lane.b32.xlu0 %v406_v25, %s362_s14 }
 0x140   :  { %280 = vrot.lane.b32.xlu1 %v415_v28, %s362_s14  ;;  %282 = vrot.lane.b32.xlu0 %v417_v29, %s362_s14 }
 0x144   :  { %284 = vrot.lane.b32.xlu1 %v433_v32, %s362_s14  ;;  %286 = vrot.lane.b32.xlu0 %v435_v33, %s362_s14 }
 0x148   :  { %288 = vrot.lane.b32.xlu1 %v93_v36, %s362_s14  ;;  %290 = vrot.lane.b32.xlu0 %v94_v37, %s362_s14 }
 0x14c   :  { %292 = vrot.lane.b32.xlu1 %v95_v39, %s362_s14  ;;  %311 = vrot.lane.b32.xlu0 %v406_v25, %s363_s15 }
 0x150   :  { %313 = vrot.lane.b32.xlu1 %v415_v28, %s363_s15  ;;  %315 = vrot.lane.b32.xlu0 %v417_v29, %s363_s15 }
 0x154   :  { %317 = vrot.lane.b32.xlu1 %v433_v32, %s363_s15  ;;  %319 = vrot.lane.b32.xlu0 %v435_v33, %s363_s15 }
 0x158   :  { %321 = vrot.lane.b32.xlu1 %v93_v36, %s363_s15  ;;  %323 = vrot.lane.b32.xlu0 %v94_v37, %s363_s15 }
 0x15c   :  { %325 = vrot.lane.b32.xlu1 %v95_v39, %s363_s15 }
 0x15e   :  { %v114_v40 = vpop.permute.xlu0 %113 }
 0x15f   :  { %138 = vst.msk [vmem:[%s721_s1] sm:$0xff] %vm137_vm1, %v114_v40 }
 0x162   :  { %v116_v41 = vpop.permute.xlu1 %115  ;;  %v118_v42 = vpop.permute.xlu0 %117 }
 0x163   :  { %139 = vst.msk [vmem:[%s721_s1 + $0x8] sm:$0xff] %vm137_vm1, %v116_v41  ;;  %140 = vst.msk [vmem:[%s721_s1 + $0x10] sm:$0xff] %vm137_vm1, %v118_v42 }
 0x166   :  { %v120_v43 = vpop.permute.xlu1 %119  ;;  %v122_v44 = vpop.permute.xlu0 %121 }
 0x167   :  { %141 = vst.msk [vmem:[%s721_s1 + $0x18] sm:$0xff] %vm137_vm1, %v120_v43  ;;  %142 = vst.msk [vmem:[%s721_s1 + $0x20] sm:$0xff] %vm137_vm1, %v122_v44 }
 0x16a   :  { %v124_v45 = vpop.permute.xlu1 %123  ;;  %v126_v46 = vpop.permute.xlu0 %125 }
 0x16b   :  { %143 = vst.msk [vmem:[%s721_s1 + $0x28] sm:$0xff] %vm137_vm1, %v124_v45  ;;  %144 = vst.msk [vmem:[%s721_s1 + $0x30] sm:$0xff] %vm137_vm1, %v126_v46 }
 0x16e   :  { %v128_v47 = vpop.permute.xlu1 %127  ;;  %v147_v48 = vpop.permute.xlu0 %146 }
 0x16f   :  { %145 = vst.msk [vmem:[%s721_s1 + $0x38] sm:$0xff] %vm137_vm1, %v128_v47 }
 0x170   :  { %171 = vst.msk [vmem:[%s721_s1] sm:$0xff] %vm170_vm2, %v147_v48 }
 0x172   :  { %v149_v49 = vpop.permute.xlu1 %148  ;;  %v151_v50 = vpop.permute.xlu0 %150 }
 0x173   :  { %172 = vst.msk [vmem:[%s721_s1 + $0x8] sm:$0xff] %vm170_vm2, %v149_v49  ;;  %173 = vst.msk [vmem:[%s721_s1 + $0x10] sm:$0xff] %vm170_vm2, %v151_v50 }
 0x176   :  { %v153_v51 = vpop.permute.xlu1 %152  ;;  %v155_v52 = vpop.permute.xlu0 %154 }
 0x177   :  { %174 = vst.msk [vmem:[%s721_s1 + $0x18] sm:$0xff] %vm170_vm2, %v153_v51  ;;  %175 = vst.msk [vmem:[%s721_s1 + $0x20] sm:$0xff] %vm170_vm2, %v155_v52 }
 0x17a   :  { %v157_v53 = vpop.permute.xlu1 %156  ;;  %v159_v54 = vpop.permute.xlu0 %158 }
 0x17b   :  { %176 = vst.msk [vmem:[%s721_s1 + $0x28] sm:$0xff] %vm170_vm2, %v157_v53  ;;  %177 = vst.msk [vmem:[%s721_s1 + $0x30] sm:$0xff] %vm170_vm2, %v159_v54 }
 0x17e   :  { %v161_v55 = vpop.permute.xlu1 %160  ;;  %v180_v56 = vpop.permute.xlu0 %179 }
 0x17f   :  { %178 = vst.msk [vmem:[%s721_s1 + $0x38] sm:$0xff] %vm170_vm2, %v161_v55 }
 0x180   :  { %204 = vst.msk [vmem:[%s721_s1] sm:$0xff] %vm203_vm3, %v180_v56 }
 0x182   :  { %v182_v57 = vpop.permute.xlu1 %181  ;;  %v184_v58 = vpop.permute.xlu0 %183 }
 0x183   :  { %205 = vst.msk [vmem:[%s721_s1 + $0x8] sm:$0xff] %vm203_vm3, %v182_v57  ;;  %206 = vst.msk [vmem:[%s721_s1 + $0x10] sm:$0xff] %vm203_vm3, %v184_v58 }
 0x186   :  { %v186_v59 = vpop.permute.xlu1 %185  ;;  %v188_v60 = vpop.permute.xlu0 %187 }
 0x187   :  { %207 = vst.msk [vmem:[%s721_s1 + $0x18] sm:$0xff] %vm203_vm3, %v186_v59  ;;  %208 = vst.msk [vmem:[%s721_s1 + $0x20] sm:$0xff] %vm203_vm3, %v188_v60 }
 0x18a   :  { %v190_v61 = vpop.permute.xlu1 %189  ;;  %v192_v62 = vpop.permute.xlu0 %191 }
 0x18b   :  { %209 = vst.msk [vmem:[%s721_s1 + $0x28] sm:$0xff] %vm203_vm3, %v190_v61  ;;  %210 = vst.msk [vmem:[%s721_s1 + $0x30] sm:$0xff] %vm203_vm3, %v192_v62 }
 0x18e   :  { %v194_v63 = vpop.permute.xlu1 %193  ;;  %v213_v0 = vpop.permute.xlu0 %212 }
 0x18f   :  { %211 = vst.msk [vmem:[%s721_s1 + $0x38] sm:$0xff] %vm203_vm3, %v194_v63 }
 0x190   :  { %237 = vst.msk [vmem:[%s721_s1] sm:$0xff] %vm236_vm4, %v213_v0 }
 0x192   :  { %v215_v1 = vpop.permute.xlu1 %214  ;;  %v217_v2 = vpop.permute.xlu0 %216 }
 0x193   :  { %238 = vst.msk [vmem:[%s721_s1 + $0x8] sm:$0xff] %vm236_vm4, %v215_v1  ;;  %239 = vst.msk [vmem:[%s721_s1 + $0x10] sm:$0xff] %vm236_vm4, %v217_v2 }
 0x196   :  { %v219_v3 = vpop.permute.xlu1 %218  ;;  %v221_v4 = vpop.permute.xlu0 %220 }
 0x197   :  { %240 = vst.msk [vmem:[%s721_s1 + $0x18] sm:$0xff] %vm236_vm4, %v219_v3  ;;  %241 = vst.msk [vmem:[%s721_s1 + $0x20] sm:$0xff] %vm236_vm4, %v221_v4 }
 0x19a   :  { %v223_v5 = vpop.permute.xlu1 %222  ;;  %v225_v6 = vpop.permute.xlu0 %224 }
 0x19b   :  { %242 = vst.msk [vmem:[%s721_s1 + $0x28] sm:$0xff] %vm236_vm4, %v223_v5  ;;  %243 = vst.msk [vmem:[%s721_s1 + $0x30] sm:$0xff] %vm236_vm4, %v225_v6 }
 0x19e   :  { %v227_v7 = vpop.permute.xlu1 %226  ;;  %v246_v8 = vpop.permute.xlu0 %245 }
 0x19f   :  { %244 = vst.msk [vmem:[%s721_s1 + $0x38] sm:$0xff] %vm236_vm4, %v227_v7 }
 0x1a0   :  { %270 = vst.msk [vmem:[%s721_s1] sm:$0xff] %vm269_vm5, %v246_v8 }
 0x1a2   :  { %v248_v9 = vpop.permute.xlu1 %247  ;;  %v250_v10 = vpop.permute.xlu0 %249 }
 0x1a3   :  { %271 = vst.msk [vmem:[%s721_s1 + $0x8] sm:$0xff] %vm269_vm5, %v248_v9  ;;  %272 = vst.msk [vmem:[%s721_s1 + $0x10] sm:$0xff] %vm269_vm5, %v250_v10 }
 0x1a6   :  { %v252_v11 = vpop.permute.xlu1 %251  ;;  %v254_v12 = vpop.permute.xlu0 %253 }
 0x1a7   :  { %273 = vst.msk [vmem:[%s721_s1 + $0x18] sm:$0xff] %vm269_vm5, %v252_v11  ;;  %274 = vst.msk [vmem:[%s721_s1 + $0x20] sm:$0xff] %vm269_vm5, %v254_v12 }
 0x1aa   :  { %v256_v13 = vpop.permute.xlu1 %255  ;;  %v258_v14 = vpop.permute.xlu0 %257 }
 0x1ab   :  { %275 = vst.msk [vmem:[%s721_s1 + $0x28] sm:$0xff] %vm269_vm5, %v256_v13  ;;  %276 = vst.msk [vmem:[%s721_s1 + $0x30] sm:$0xff] %vm269_vm5, %v258_v14 }
 0x1ae   :  { %v260_v15 = vpop.permute.xlu1 %259  ;;  %v279_v16 = vpop.permute.xlu0 %278 }
 0x1af   :  { %277 = vst.msk [vmem:[%s721_s1 + $0x38] sm:$0xff] %vm269_vm5, %v260_v15 }
 0x1b0   :  { %303 = vst.msk [vmem:[%s721_s1] sm:$0xff] %vm302_vm6, %v279_v16 }
 0x1b2   :  { %v281_v17 = vpop.permute.xlu1 %280  ;;  %v283_v18 = vpop.permute.xlu0 %282 }
 0x1b3   :  { %304 = vst.msk [vmem:[%s721_s1 + $0x8] sm:$0xff] %vm302_vm6, %v281_v17  ;;  %305 = vst.msk [vmem:[%s721_s1 + $0x10] sm:$0xff] %vm302_vm6, %v283_v18 }
 0x1b6   :  { %v285_v19 = vpop.permute.xlu1 %284  ;;  %v287_v20 = vpop.permute.xlu0 %286 }
 0x1b7   :  { %306 = vst.msk [vmem:[%s721_s1 + $0x18] sm:$0xff] %vm302_vm6, %v285_v19  ;;  %307 = vst.msk [vmem:[%s721_s1 + $0x20] sm:$0xff] %vm302_vm6, %v287_v20 }
 0x1ba   :  { %v289_v21 = vpop.permute.xlu1 %288  ;;  %v291_v22 = vpop.permute.xlu0 %290 }
 0x1bb   :  { %308 = vst.msk [vmem:[%s721_s1 + $0x28] sm:$0xff] %vm302_vm6, %v289_v21  ;;  %309 = vst.msk [vmem:[%s721_s1 + $0x30] sm:$0xff] %vm302_vm6, %v291_v22 }
 0x1be   :  { %v293_v23 = vpop.permute.xlu1 %292  ;;  %v312_v24 = vpop.permute.xlu0 %311 }
 0x1bf   :  { %310 = vst.msk [vmem:[%s721_s1 + $0x38] sm:$0xff] %vm302_vm6, %v293_v23 }
 0x1c0   :  { %336 = vst.msk [vmem:[%s721_s1] sm:$0xff] %vm335_vm7, %v312_v24 }
 0x1c2   :  { %v314_v25 = vpop.permute.xlu1 %313  ;;  %v316_v26 = vpop.permute.xlu0 %315 }
 0x1c3   :  { %337 = vst.msk [vmem:[%s721_s1 + $0x8] sm:$0xff] %vm335_vm7, %v314_v25  ;;  %338 = vst.msk [vmem:[%s721_s1 + $0x10] sm:$0xff] %vm335_vm7, %v316_v26 }
 0x1c6   :  { %v318_v27 = vpop.permute.xlu1 %317  ;;  %v320_v28 = vpop.permute.xlu0 %319 }
 0x1c7   :  { %339 = vst.msk [vmem:[%s721_s1 + $0x18] sm:$0xff] %vm335_vm7, %v318_v27  ;;  %340 = vst.msk [vmem:[%s721_s1 + $0x20] sm:$0xff] %vm335_vm7, %v320_v28 }
 0x1ca   :  { %v322_v29 = vpop.permute.xlu1 %321  ;;  %v324_v30 = vpop.permute.xlu0 %323 }
 0x1cb   :  { %341 = vst.msk [vmem:[%s721_s1 + $0x28] sm:$0xff] %vm335_vm7, %v322_v29  ;;  %342 = vst.msk [vmem:[%s721_s1 + $0x30] sm:$0xff] %vm335_vm7, %v324_v30 }
 0x1ce   :  { %v326_v31 = vpop.permute.xlu1 %325 }
 0x1cf   :  { %343 = vst.msk [vmem:[%s721_s1 + $0x38] sm:$0xff] %vm335_vm7, %v326_v31 }

// kernel: deform_down_forward.8
= control target key start
LH: loop header
LB: loop body
LE: loop exit
PB: predicated region body
PF: predicated region fallthrough
CT: control target
= control target key end

     0   :  { %s483_s1 = inlined_call_operand.vmem [shape: bf16[128,128], index: 1, kind: input, shape index: {}]   ;;  %s484_s0 = inlined_call_operand.vmem [shape: bf16[128,128], index: 0, kind: input, shape index: {}]   ;;  %s485_s2 = inlined_call_operand.vmem [shape: f32[1,128], index: 2, kind: input, shape index: {}]   ;;  %s486_s3 = inlined_call_operand.vmem [shape: f32[128,128], index: 3, kind: output, shape index: {}]  }
   0x1   :  { %v348_v0 = vld [vmem:[%s483_s1] sm:$0xff]   ;;  %v349_v1 = vld [vmem:[%s483_s1 + $0x8] sm:$0xff]   ;;  %v350_v2 = vld [vmem:[%s483_s1 + $0x10] sm:$0xff]  }
   0x2   :  { %300 = vmatprep.subr.bf16.mxu0 %v348_v0  ;;  %332 = vmatprep.subr.bf16.mxu1 %v348_v0  ;;  %v351_v3 = vld [vmem:[%s483_s1 + $0x18] sm:$0xff]   ;;  %v356_v4 = vld [vmem:[%s484_s0] sm:$0xff]   ;;  %v353_v7 = vld [vmem:[%s483_s1 + $0x28] sm:$0xff]  }
   0x3   :  { %301 = vmatpush3.bf16.msra.mxu0 %v348_v0  ;;  %340 = vmatpush3.bf16.msra.mxu1 %v348_v0  ;;  %v357_v5 = vld [vmem:[%s484_s0 + $0x20] sm:$0xff]   ;;  %v354_v8 = vld [vmem:[%s483_s1 + $0x30] sm:$0xff]   ;;  %v355_v9 = vld [vmem:[%s483_s1 + $0x38] sm:$0xff]  }
   0x4   :  { %302 = vmatprep.subr.bf16.mxu0 %v349_v1  ;;  %333 = vmatprep.subr.bf16.mxu1 %v349_v1  ;;  %v352_v6 = vld [vmem:[%s483_s1 + $0x20] sm:$0xff]   ;;  %v358_v10 = vld [vmem:[%s484_s0 + $0x8] sm:$0xff]   ;;  %v360_v12 = vld [vmem:[%s484_s0 + $0x10] sm:$0xff]  }
   0x5   :  { %316 = vmatprep.mubr.bf16.mxu0 %v356_v4  ;;  %324 = vmatprep.mubr.bf16.mxu1 %v357_v5  ;;  %v359_v11 = vld [vmem:[%s484_s0 + $0x28] sm:$0xff]   ;;  %v361_v13 = vld [vmem:[%s484_s0 + $0x30] sm:$0xff]   ;;  %v362_v14 = vld [vmem:[%s484_s0 + $0x18] sm:$0xff]  }
   0x6   :  { %v363_v15 = vld [vmem:[%s484_s0 + $0x38] sm:$0xff]   ;;  %v267_v16 = vld [vmem:[%s485_s2] ss:$0 sm:$0xff] }
   0x7   :  { %303 = vmatpush3.bf16.msra.mxu0 %v349_v1  ;;  %341 = vmatpush3.bf16.msra.mxu1 %v349_v1 }
   0x8   :  { %304 = vmatprep.subr.bf16.mxu0 %v350_v2  ;;  %334 = vmatprep.subr.bf16.mxu1 %v350_v2 }
   0xb   :  { %305 = vmatpush3.bf16.msra.mxu0 %v350_v2  ;;  %342 = vmatpush3.bf16.msra.mxu1 %v350_v2 }
   0xc   :  { %306 = vmatprep.subr.bf16.mxu0 %v351_v3  ;;  %335 = vmatprep.subr.bf16.mxu1 %v351_v3 }
   0xf   :  { %307 = vmatpush3.bf16.msra.mxu0 %v351_v3  ;;  %343 = vmatpush3.bf16.msra.mxu1 %v351_v3 }
  0x10   :  { %308 = vmatprep.subr.bf16.mxu0 %v352_v6  ;;  %336 = vmatprep.subr.bf16.mxu1 %v352_v6 }
  0x13   :  { %309 = vmatpush3.bf16.msra.mxu0 %v352_v6  ;;  %344 = vmatpush3.bf16.msra.mxu1 %v352_v6 }
  0x14   :  { %310 = vmatprep.subr.bf16.mxu0 %v353_v7  ;;  %337 = vmatprep.subr.bf16.mxu1 %v353_v7 }
  0x17   :  { %311 = vmatpush3.bf16.msra.mxu0 %v353_v7  ;;  %345 = vmatpush3.bf16.msra.mxu1 %v353_v7 }
  0x18   :  { %312 = vmatprep.subr.bf16.mxu0 %v354_v8  ;;  %338 = vmatprep.subr.bf16.mxu1 %v354_v8 }
  0x1b   :  { %313 = vmatpush3.bf16.msra.mxu0 %v354_v8  ;;  %346 = vmatpush3.bf16.msra.mxu1 %v354_v8 }
  0x1c   :  { %314 = vmatprep.subr.bf16.mxu0 %v355_v9  ;;  %339 = vmatprep.subr.bf16.mxu1 %v355_v9 }
  0x1f   :  { %315 = vmatpush3.bf16.msra.mxu0 %v355_v9  ;;  %347 = vmatpush3.bf16.msra.mxu1 %v355_v9 }
  0x22   :  { %317 = vmatmul.mubr.bf16.vlgmr.msra.gmra.mrb[0].mxu0 %v358_v10  ;;  %325 = vmatmul.mubr.bf16.vlgmr.msra.gmra.mrb[0].mxu1 %v359_v11 }
  0x23   :  { %320 = vmatprep.mubr.bf16.mxu0 %v360_v12  ;;  %328 = vmatprep.mubr.bf16.mxu1 %v361_v13 }
  0x2a   :  { %321 = vmatmul.mubr.bf16.gmra.mrb[4].mxu0 %v362_v14  ;;  %329 = vmatmul.mubr.bf16.gmra.mrb[4].mxu1 %v363_v15 }
  0xf5   :  { %v318_v17 = vpop.f32.mrb[0].mxu0  ;;  %v326_v18 = vpop.f32.mrb[0].mxu1 }
  0xf6   :  { %v193_v19 = vadd.f32 %v318_v17, %v267_v16  ;;  %v225_v20 = vadd.f32 %v326_v18, %v267_v16  ;;  %v184_v21 = vpop.f32.mrb[1].mxu0  ;;  %v216_v22 = vpop.f32.mrb[1].mxu1 }
  0xf7   :  { %v185_v23 = vadd.f32 %v267_v16, %v184_v21  ;;  %v217_v24 = vadd.f32 %v267_v16, %v216_v22  ;;  %v319_v25 = vpop.f32.mrb[2].mxu0  ;;  %v327_v26 = vpop.f32.mrb[2].mxu1 }
  0xf8   :  { %249 = vst [vmem:[%s486_s3 + $0x10] sm:$0xff] %v193_v19  ;;  %257 = vst [vmem:[%s486_s3 + $0x50] sm:$0xff] %v225_v20  ;;  %v196_v27 = vadd.f32 %v319_v25, %v267_v16  ;;  %v228_v28 = vadd.f32 %v327_v26, %v267_v16  ;;  %v187_v29 = vpop.f32.mrb[3].mxu0  ;;  %v219_v30 = vpop.f32.mrb[3].mxu1 }
  0xf9   :  { %247 = vst [vmem:[%s486_s3] sm:$0xff] %v185_v23  ;;  %255 = vst [vmem:[%s486_s3 + $0x40] sm:$0xff] %v217_v24  ;;  %v188_v31 = vadd.f32 %v267_v16, %v187_v29  ;;  %v220_v32 = vadd.f32 %v267_v16, %v219_v30 }
  0xfa   :  { %250 = vst [vmem:[%s486_s3 + $0x18] sm:$0xff] %v196_v27  ;;  %258 = vst [vmem:[%s486_s3 + $0x58] sm:$0xff] %v228_v28 }
  0xfb   :  { %248 = vst [vmem:[%s486_s3 + $0x8] sm:$0xff] %v188_v31  ;;  %256 = vst [vmem:[%s486_s3 + $0x48] sm:$0xff] %v220_v32 }
  0xfd   :  { %v322_v33 = vpop.f32.mrb[4].mxu0  ;;  %v330_v34 = vpop.f32.mrb[4].mxu1 }
  0xfe   :  { %v209_v35 = vadd.f32 %v322_v33, %v267_v16  ;;  %v241_v36 = vadd.f32 %v330_v34, %v267_v16  ;;  %v200_v37 = vpop.f32.mrb[5].mxu0  ;;  %v232_v38 = vpop.f32.mrb[5].mxu1 }
  0xff   :  { %v201_v39 = vadd.f32 %v267_v16, %v200_v37  ;;  %v233_v40 = vadd.f32 %v267_v16, %v232_v38  ;;  %v323_v41 = vpop.f32.mrb[6].mxu0  ;;  %v331_v42 = vpop.f32.mrb[6].mxu1 }
 0x100   :  { %253 = vst [vmem:[%s486_s3 + $0x30] sm:$0xff] %v209_v35  ;;  %261 = vst [vmem:[%s486_s3 + $0x70] sm:$0xff] %v241_v36  ;;  %v212_v43 = vadd.f32 %v323_v41, %v267_v16  ;;  %v244_v44 = vadd.f32 %v331_v42, %v267_v16  ;;  %v203_v45 = vpop.f32.mrb[7].mxu0  ;;  %v235_v46 = vpop.f32.mrb[7].mxu1 }
 0x101   :  { %251 = vst [vmem:[%s486_s3 + $0x20] sm:$0xff] %v201_v39  ;;  %259 = vst [vmem:[%s486_s3 + $0x60] sm:$0xff] %v233_v40  ;;  %v204_v47 = vadd.f32 %v267_v16, %v203_v45  ;;  %v236_v48 = vadd.f32 %v267_v16, %v235_v46 }
 0x102   :  { %254 = vst [vmem:[%s486_s3 + $0x38] sm:$0xff] %v212_v43  ;;  %262 = vst [vmem:[%s486_s3 + $0x78] sm:$0xff] %v244_v44 }
 0x103   :  { %252 = vst [vmem:[%s486_s3 + $0x28] sm:$0xff] %v204_v47  ;;  %260 = vst [vmem:[%s486_s3 + $0x68] sm:$0xff] %v236_v48 }

// kernel: deform_down_forward.9
= control target key start
LH: loop header
LB: loop body
LE: loop exit
PB: predicated region body
PF: predicated region fallthrough
CT: control target
= control target key end

     0   :  { %v421_v16 = vmov 0.0   ;;  %s547_s1 = inlined_call_operand.vmem [shape: bf16[128,128], index: 1, kind: input, shape index: {}]   ;;  %s548_s0 = inlined_call_operand.vmem [shape: bf16[128,128], index: 0, kind: input, shape index: {}]   ;;  %s549_s3 = inlined_call_operand.vmem [shape: f32[8,128], index: 3, kind: output, shape index: {1}]   ;;  %s550_s2 = inlined_call_operand.vmem [shape: f32[128,128], index: 2, kind: output, shape index: {0}]  }
   0x1   :  { %v405_v0 = vld [vmem:[%s547_s1] sm:$0xff]   ;;  %v406_v1 = vld [vmem:[%s547_s1 + $0x8] sm:$0xff]   ;;  %v407_v2 = vld [vmem:[%s547_s1 + $0x10] sm:$0xff]   ;;  %315 = vst [vmem:[%s549_s3 + $0x2] sm:$0x3f] %v421_v16 }
   0x2   :  { %356 = vmatprep.subr.bf16.mxu0 %v405_v0  ;;  %388 = vmatprep.subr.bf16.mxu1 %v405_v0  ;;  %v408_v3 = vld [vmem:[%s547_s1 + $0x18] sm:$0xff]   ;;  %v413_v4 = vld [vmem:[%s548_s0] sm:$0xff]   ;;  %v410_v7 = vld [vmem:[%s547_s1 + $0x28] sm:$0xff]  }
   0x3   :  { %357 = vmatpush3.bf16.msra.mxu0 %v405_v0  ;;  %396 = vmatpush3.bf16.msra.mxu1 %v405_v0  ;;  %v409_v5 = vld [vmem:[%s547_s1 + $0x20] sm:$0xff]   ;;  %v411_v8 = vld [vmem:[%s547_s1 + $0x30] sm:$0xff]   ;;  %v412_v9 = vld [vmem:[%s547_s1 + $0x38] sm:$0xff]  }
   0x4   :  { %358 = vmatprep.subr.bf16.mxu0 %v406_v1  ;;  %389 = vmatprep.subr.bf16.mxu1 %v406_v1  ;;  %v417_v6 = vld [vmem:[%s548_s0 + $0x20] sm:$0xff]   ;;  %v414_v10 = vld [vmem:[%s548_s0 + $0x8] sm:$0xff]   ;;  %v415_v12 = vld [vmem:[%s548_s0 + $0x10] sm:$0xff]  }
   0x5   :  { %372 = vmatprep.mubr.bf16.mxu0 %v413_v4  ;;  %380 = vmatprep.mubr.bf16.mxu1 %v417_v6  ;;  %v418_v11 = vld [vmem:[%s548_s0 + $0x28] sm:$0xff]   ;;  %v419_v13 = vld [vmem:[%s548_s0 + $0x30] sm:$0xff]   ;;  %v416_v14 = vld [vmem:[%s548_s0 + $0x18] sm:$0xff]  }
   0x6   :  { %v420_v15 = vld [vmem:[%s548_s0 + $0x38] sm:$0xff]  }
   0x7   :  { %359 = vmatpush3.bf16.msra.mxu0 %v406_v1  ;;  %397 = vmatpush3.bf16.msra.mxu1 %v406_v1 }
   0x8   :  { %360 = vmatprep.subr.bf16.mxu0 %v407_v2  ;;  %390 = vmatprep.subr.bf16.mxu1 %v407_v2 }
   0xb   :  { %361 = vmatpush3.bf16.msra.mxu0 %v407_v2  ;;  %398 = vmatpush3.bf16.msra.mxu1 %v407_v2 }
   0xc   :  { %362 = vmatprep.subr.bf16.mxu0 %v408_v3  ;;  %391 = vmatprep.subr.bf16.mxu1 %v408_v3 }
   0xf   :  { %363 = vmatpush3.bf16.msra.mxu0 %v408_v3  ;;  %399 = vmatpush3.bf16.msra.mxu1 %v408_v3 }
  0x10   :  { %364 = vmatprep.subr.bf16.mxu0 %v409_v5  ;;  %392 = vmatprep.subr.bf16.mxu1 %v409_v5 }
  0x13   :  { %365 = vmatpush3.bf16.msra.mxu0 %v409_v5  ;;  %400 = vmatpush3.bf16.msra.mxu1 %v409_v5 }
  0x14   :  { %366 = vmatprep.subr.bf16.mxu0 %v410_v7  ;;  %393 = vmatprep.subr.bf16.mxu1 %v410_v7 }
  0x17   :  { %367 = vmatpush3.bf16.msra.mxu0 %v410_v7  ;;  %401 = vmatpush3.bf16.msra.mxu1 %v410_v7 }
  0x18   :  { %368 = vmatprep.subr.bf16.mxu0 %v411_v8  ;;  %394 = vmatprep.subr.bf16.mxu1 %v411_v8 }
  0x1b   :  { %369 = vmatpush3.bf16.msra.mxu0 %v411_v8  ;;  %402 = vmatpush3.bf16.msra.mxu1 %v411_v8 }
  0x1c   :  { %370 = vmatprep.subr.bf16.mxu0 %v412_v9  ;;  %395 = vmatprep.subr.bf16.mxu1 %v412_v9 }
  0x1f   :  { %371 = vmatpush3.bf16.msra.mxu0 %v412_v9  ;;  %403 = vmatpush3.bf16.msra.mxu1 %v412_v9 }
  0x22   :  { %373 = vmatmul.mubr.bf16.vlgmr.msra.gmra.mrb[0].mxu0 %v414_v10  ;;  %381 = vmatmul.mubr.bf16.vlgmr.msra.gmra.mrb[0].mxu1 %v418_v11 }
  0x23   :  { %376 = vmatprep.mubr.bf16.mxu0 %v415_v12  ;;  %384 = vmatprep.mubr.bf16.mxu1 %v419_v13 }
  0x2a   :  { %377 = vmatmul.mubr.bf16.gmra.mrb[4].mxu0 %v416_v14  ;;  %385 = vmatmul.mubr.bf16.gmra.mrb[4].mxu1 %v420_v15 }
  0xf5   :  { %v374_v17 = vpop.f32.mrb[0].mxu0  ;;  %v382_v18 = vpop.f32.mrb[0].mxu1 }
  0xf6   :  { %241 = vst [vmem:[%s550_s2 + $0x10] sm:$0xff] %v374_v17  ;;  %v176_v19 = vpop.f32.mrb[1].mxu0  ;;  %249 = vst [vmem:[%s550_s2 + $0x50] sm:$0xff] %v382_v18  ;;  %v208_v20 = vpop.f32.mrb[1].mxu1  ;;  %v279_v28 = vmul.f32 %v374_v17, %v374_v17  ;;  %v287_v60 = vmul.f32 %v382_v18, %v382_v18 }
  0xf7   :  { %239 = vst [vmem:[%s550_s2] sm:$0xff] %v176_v19  ;;  %v375_v21 = vpop.f32.mrb[2].mxu0  ;;  %247 = vst [vmem:[%s550_s2 + $0x40] sm:$0xff] %v208_v20  ;;  %v383_v22 = vpop.f32.mrb[2].mxu1  ;;  %v277_v25 = vmul.f32 %v176_v19, %v176_v19  ;;  %v285_v54 = vmul.f32 %v208_v20, %v208_v20 }
  0xf8   :  { %242 = vst [vmem:[%s550_s2 + $0x18] sm:$0xff] %v375_v21  ;;  %v179_v23 = vpop.f32.mrb[3].mxu0  ;;  %250 = vst [vmem:[%s550_s2 + $0x58] sm:$0xff] %v383_v22  ;;  %v211_v24 = vpop.f32.mrb[3].mxu1  ;;  %v280_v31 = vmul.f32 %v375_v21, %v375_v21  ;;  %v288_v63 = vmul.f32 %v383_v22, %v383_v22 }
  0xf9   :  { %240 = vst [vmem:[%s550_s2 + $0x8] sm:$0xff] %v179_v23  ;;  %v255_v26 = vadd.f32 %v179_v23, %v176_v19  ;;  %v278_v27 = vmul.f32 %v179_v23, %v179_v23  ;;  %248 = vst [vmem:[%s550_s2 + $0x48] sm:$0xff] %v211_v24  ;;  %v286_v59 = vmul.f32 %v211_v24, %v211_v24 }
  0xfb   :  { %v256_v29 = vadd.f32 %v374_v17, %v255_v26  ;;  %v293_v30 = vadd.f32 %v278_v27, %v277_v25 }
  0xfd   :  { %v294_v32 = vadd.f32 %v293_v30, %v279_v28  ;;  %v378_v33 = vpop.f32.mrb[4].mxu0  ;;  %v257_v34 = vadd.f32 %v375_v21, %v256_v29  ;;  %v386_v35 = vpop.f32.mrb[4].mxu1 }
  0xfe   :  { %245 = vst [vmem:[%s550_s2 + $0x30] sm:$0xff] %v378_v33  ;;  %v192_v36 = vpop.f32.mrb[5].mxu0  ;;  %253 = vst [vmem:[%s550_s2 + $0x70] sm:$0xff] %v386_v35  ;;  %v224_v37 = vpop.f32.mrb[5].mxu1  ;;  %v283_v48 = vmul.f32 %v378_v33, %v378_v33  ;;  %v291_v8 = vmul.f32 %v386_v35, %v386_v35 }
  0xff   :  { %243 = vst [vmem:[%s550_s2 + $0x20] sm:$0xff] %v192_v36  ;;  %v258_v38 = vadd.f32 %v257_v34, %v192_v36  ;;  %v281_v39 = vmul.f32 %v192_v36, %v192_v36  ;;  %v295_v40 = vadd.f32 %v294_v32, %v280_v31  ;;  %v379_v41 = vpop.f32.mrb[6].mxu0  ;;  %251 = vst [vmem:[%s550_s2 + $0x60] sm:$0xff] %v224_v37  ;;  %v387_v42 = vpop.f32.mrb[6].mxu1 }
 0x100   :  { %246 = vst [vmem:[%s550_s2 + $0x38] sm:$0xff] %v379_v41  ;;  %v195_v43 = vpop.f32.mrb[7].mxu0  ;;  %254 = vst [vmem:[%s550_s2 + $0x78] sm:$0xff] %v387_v42  ;;  %v227_v44 = vpop.f32.mrb[7].mxu1  ;;  %v284_v51 = vmul.f32 %v379_v41, %v379_v41  ;;  %v289_v2 = vmul.f32 %v224_v37, %v224_v37  ;;  %v292_v11 = vmul.f32 %v387_v42, %v387_v42 }
 0x101   :  { %v296_v45 = vadd.f32 %v295_v40, %v281_v39  ;;  %244 = vst [vmem:[%s550_s2 + $0x28] sm:$0xff] %v195_v43  ;;  %v259_v46 = vadd.f32 %v258_v38, %v195_v43  ;;  %v282_v47 = vmul.f32 %v195_v43, %v195_v43  ;;  %252 = vst [vmem:[%s550_s2 + $0x68] sm:$0xff] %v227_v44 }
 0x102   :  { %v290_v7 = vmul.f32 %v227_v44, %v227_v44 }
 0x103   :  { %v260_v49 = vadd.f32 %v378_v33, %v259_v46  ;;  %v297_v50 = vadd.f32 %v296_v45, %v282_v47 }
 0x105   :  { %v298_v52 = vadd.f32 %v297_v50, %v283_v48  ;;  %v261_v53 = vadd.f32 %v379_v41, %v260_v49 }
 0x107   :  { %v262_v55 = vadd.f32 %v261_v53, %v208_v20  ;;  %v299_v56 = vadd.f32 %v298_v52, %v284_v51 }
 0x109   :  { %v300_v57 = vadd.f32 %v299_v56, %v285_v54  ;;  %v263_v58 = vadd.f32 %v262_v55, %v211_v24 }
 0x10b   :  { %v264_v61 = vadd.f32 %v382_v18, %v263_v58  ;;  %v301_v62 = vadd.f32 %v300_v57, %v286_v59 }
 0x10d   :  { %v302_v0 = vadd.f32 %v301_v62, %v287_v60  ;;  %v265_v1 = vadd.f32 %v383_v22, %v264_v61 }
 0x10f   :  { %v266_v3 = vadd.f32 %v265_v1, %v224_v37  ;;  %v303_v4 = vadd.f32 %v302_v0, %v288_v63 }
 0x111   :  { %v304_v5 = vadd.f32 %v303_v4, %v289_v2  ;;  %v267_v6 = vadd.f32 %v266_v3, %v227_v44 }
 0x113   :  { %v268_v9 = vadd.f32 %v386_v35, %v267_v6  ;;  %v305_v10 = vadd.f32 %v304_v5, %v290_v7 }
 0x115   :  { %v269_v12 = vadd.f32 %v387_v42, %v268_v9  ;;  %v306_v13 = vadd.f32 %v305_v10, %v291_v8 }
 0x117   :  { %v270_v14 = vrot.slane %v269_v12, 4  ;;  %v307_v15 = vadd.f32 %v306_v13, %v292_v11 }
 0x119   :  { %v271_v16 = vadd.f32 %v270_v14, %v269_v12  ;;  %v308_v17 = vrot.slane %v307_v15, 4 }
 0x11b   :  { %v272_v18 = vrot.slane %v271_v16, 2  ;;  %v309_v19 = vadd.f32 %v308_v17, %v307_v15 }
 0x11d   :  { %v273_v20 = vadd.f32 %v272_v18, %v271_v16  ;;  %v310_v21 = vrot.slane %v309_v19, 2 }
 0x11f   :  { %v274_v22 = vrot.slane %v273_v20, 1  ;;  %v311_v23 = vadd.f32 %v310_v21, %v309_v19 }
 0x121   :  { %v275_v24 = vadd.f32 %v274_v22, %v273_v20  ;;  %v312_v25 = vrot.slane %v311_v23, 1 }
 0x123   :  { %276 = vst [vmem:[%s549_s3] sm:$0x1] %v275_v24  ;;  %v313_v26 = vadd.f32 %v312_v25, %v311_v23 }
 0x125   :  { %314 = vst [vmem:[%s549_s3 + $0x1] sm:$0x1] %v313_v26 }

// kernel: deform_down_forward.10
= control target key start
LH: loop header
LB: loop body
LE: loop exit
PB: predicated region body
PF: predicated region fallthrough
CT: control target
= control target key end

     0   :  { %s254_s0 = inlined_call_operand.vmem [shape: f32[128,128], index: 0, kind: input, shape index: {}]   ;;  %s255_s1 = inlined_call_operand.vmem [shape: f32[1,128], index: 1, kind: input, shape index: {}]   ;;  %s256_s2 = inlined_call_operand.vmem [shape: f32[1,128], index: 2, kind: input, shape index: {}]   ;;  %s257_s3 = inlined_call_operand.vmem [shape: f32[128,128], index: 3, kind: output, shape index: {}]  }
   0x1   :  { %v14_v0 = vld [vmem:[%s254_s0] sm:$0xff]  ;;  %v15_v4 = vld [vmem:[%s254_s0 + $0x8] sm:$0xff]  ;;  %v16_v5 = vld [vmem:[%s254_s0 + $0x10] sm:$0xff] }
   0x2   :  { %v112_v1 = vld [vmem:[%s255_s1] ss:$0 sm:$0xff]  ;;  %v17_v6 = vld [vmem:[%s254_s0 + $0x18] sm:$0xff]  ;;  %v19_v11 = vld [vmem:[%s254_s0 + $0x28] sm:$0xff] }
   0x3   :  { %v143_v2 = vld [vmem:[%s256_s2] ss:$0 sm:$0xff]  ;;  %v37_v3 = vmul.f32 %v112_v1, %v14_v0  ;;  %v38_v7 = vmul.f32 %v112_v1, %v15_v4  ;;  %v39_v8 = vmul.f32 %v112_v1, %v16_v5  ;;  %v40_v9 = vmul.f32 %v112_v1, %v17_v6  ;;  %v20_v12 = vld [vmem:[%s254_s0 + $0x30] sm:$0xff]  ;;  %v21_v17 = vld [vmem:[%s254_s0 + $0x38] sm:$0xff] }
   0x4   :  { %v18_v10 = vld [vmem:[%s254_s0 + $0x20] sm:$0xff]  ;;  %v42_v15 = vmul.f32 %v112_v1, %v19_v11  ;;  %v43_v16 = vmul.f32 %v112_v1, %v20_v12  ;;  %v44_v21 = vmul.f32 %v112_v1, %v21_v17  ;;  %v23_v27 = vld [vmem:[%s254_s0 + $0x48] sm:$0xff]  ;;  %v24_v28 = vld [vmem:[%s254_s0 + $0x50] sm:$0xff] }
   0x5   :  { %v60_v13 = vadd.f32 %v143_v2, %v37_v3  ;;  %v41_v14 = vmul.f32 %v112_v1, %v18_v10  ;;  %v61_v18 = vadd.f32 %v143_v2, %v38_v7  ;;  %v62_v19 = vadd.f32 %v143_v2, %v39_v8  ;;  %v22_v22 = vld [vmem:[%s254_s0 + $0x40] sm:$0xff]  ;;  %v25_v29 = vld [vmem:[%s254_s0 + $0x58] sm:$0xff]  ;;  %v27_v35 = vld [vmem:[%s254_s0 + $0x68] sm:$0xff] }
   0x6   :  { %v63_v20 = vadd.f32 %v143_v2, %v40_v9  ;;  %v65_v25 = vadd.f32 %v143_v2, %v42_v15  ;;  %v66_v26 = vadd.f32 %v143_v2, %v43_v16  ;;  %v67_v33 = vadd.f32 %v143_v2, %v44_v21  ;;  %v26_v34 = vld [vmem:[%s254_s0 + $0x60] sm:$0xff]  ;;  %v28_v36 = vld [vmem:[%s254_s0 + $0x70] sm:$0xff]  ;;  %v29_v41 = vld [vmem:[%s254_s0 + $0x78] sm:$0xff] }
   0x7   :  { %v76_v23 = vmax.f32 %v60_v13, 0.0  ;;  %v64_v24 = vadd.f32 %v143_v2, %v41_v14  ;;  %v77_v30 = vmax.f32 %v61_v18, 0.0  ;;  %v78_v31 = vmax.f32 %v62_v19, 0.0 }
   0x8   :  { %v79_v32 = vmax.f32 %v63_v20, 0.0  ;;  %v81_v38 = vmax.f32 %v65_v25, 0.0  ;;  %v82_v39 = vmax.f32 %v66_v26, 0.0  ;;  %v45_v40 = vmul.f32 %v112_v1, %v22_v22 }
   0x9   :  { %92 = vst [vmem:[%s257_s3] sm:$0xff] %v76_v23  ;;  %v80_v37 = vmax.f32 %v64_v24, 0.0  ;;  %93 = vst [vmem:[%s257_s3 + $0x8] sm:$0xff] %v77_v30  ;;  %v83_v42 = vmax.f32 %v67_v33, 0.0  ;;  %v46_v43 = vmul.f32 %v112_v1, %v23_v27  ;;  %v47_v44 = vmul.f32 %v112_v1, %v24_v28 }
   0xa   :  { %94 = vst [vmem:[%s257_s3 + $0x10] sm:$0xff] %v78_v31  ;;  %95 = vst [vmem:[%s257_s3 + $0x18] sm:$0xff] %v79_v32  ;;  %v48_v45 = vmul.f32 %v112_v1, %v25_v29  ;;  %v68_v46 = vadd.f32 %v143_v2, %v45_v40  ;;  %v49_v47 = vmul.f32 %v112_v1, %v26_v34 }
   0xb   :  { %96 = vst [vmem:[%s257_s3 + $0x20] sm:$0xff] %v80_v37  ;;  %97 = vst [vmem:[%s257_s3 + $0x28] sm:$0xff] %v81_v38  ;;  %v50_v48 = vmul.f32 %v112_v1, %v27_v35  ;;  %v51_v49 = vmul.f32 %v112_v1, %v28_v36  ;;  %v69_v50 = vadd.f32 %v143_v2, %v46_v43 }
   0xc   :  { %98 = vst [vmem:[%s257_s3 + $0x30] sm:$0xff] %v82_v39  ;;  %99 = vst [vmem:[%s257_s3 + $0x38] sm:$0xff] %v83_v42  ;;  %v70_v51 = vadd.f32 %v143_v2, %v47_v44  ;;  %v71_v52 = vadd.f32 %v143_v2, %v48_v45  ;;  %v52_v53 = vmul.f32 %v112_v1, %v29_v41  ;;  %v84_v54 = vmax.f32 %v68_v46, 0.0 }
   0xd   :  { %v72_v55 = vadd.f32 %v143_v2, %v49_v47  ;;  %v73_v56 = vadd.f32 %v143_v2, %v50_v48  ;;  %v74_v57 = vadd.f32 %v143_v2, %v51_v49  ;;  %v85_v58 = vmax.f32 %v69_v50, 0.0 }
   0xe   :  { %v86_v59 = vmax.f32 %v70_v51, 0.0  ;;  %v87_v60 = vmax.f32 %v71_v52, 0.0  ;;  %v75_v61 = vadd.f32 %v143_v2, %v52_v53  ;;  %100 = vst [vmem:[%s257_s3 + $0x40] sm:$0xff] %v84_v54 }
   0xf   :  { %v88_v62 = vmax.f32 %v72_v55, 0.0  ;;  %v89_v63 = vmax.f32 %v73_v56, 0.0  ;;  %v90_v0 = vmax.f32 %v74_v57, 0.0  ;;  %101 = vst [vmem:[%s257_s3 + $0x48] sm:$0xff] %v85_v58 }
  0x10   :  { %102 = vst [vmem:[%s257_s3 + $0x50] sm:$0xff] %v86_v59  ;;  %103 = vst [vmem:[%s257_s3 + $0x58] sm:$0xff] %v87_v60  ;;  %v91_v1 = vmax.f32 %v75_v61, 0.0 }
  0x11   :  { %104 = vst [vmem:[%s257_s3 + $0x60] sm:$0xff] %v88_v62  ;;  %105 = vst [vmem:[%s257_s3 + $0x68] sm:$0xff] %v89_v63 }
  0x12   :  { %106 = vst [vmem:[%s257_s3 + $0x70] sm:$0xff] %v90_v0  ;;  %107 = vst [vmem:[%s257_s3 + $0x78] sm:$0xff] %v91_v1 }

</bundles_post_ra>
